<compile_context>
chip_gen: v7x
topology: tpu7x:2x2x1
jax: 0.10.0
libtpu: 0.0.40
codegen_flags: <defaults>
</compile_context>

<pallas_src>
import functools
import math
from math import ceil

import jax
import jax.numpy as jnp
from jax.experimental import pallas as pl
from jax.experimental.pallas import tpu as pltpu


_PARAM_ORDER = ("qbd", "cmask", "rsel", "q0r", "wk", "wv", "wo", "bo")


# -----------------------------------------------------------------------------
# Fused kernel: the whole model_sequence (all PMA layers) in one pallas_call.
# Grid-free (single invocation, single TC), no scratch, single output store.
# -----------------------------------------------------------------------------
def _pma_stack_kernel(x_ref, p_ref, o_ref, *, layer_specs):
    def ld(off):                      # static (row0, rows, cols) window of the packed buffer
        r0, r, c = off
        return p_ref[r0:r0 + r, :c]

    x = x_ref[...]                    # (B, N0, d0) f32
    B = x.shape[0]

    for sp in layer_specs:            # statically unrolled (2 layers here)
        dV, ns, hns = sp["dV"], sp["ns"], sp["hns"]
        offs = sp["offs"]
        qbd   = ld(offs["qbd"])       # (H*ns, dV) block-diag fc_q(S), pre-scaled 1/sqrt(dV)
        cmask = ld(offs["cmask"])     # (H*ns, dV) head-column ownership mask
        rsel  = ld(offs["rsel"])      # (ns, H*ns) merges per-head row blocks back to seeds
        q0r   = ld(offs["q0r"])       # (ns, dV)   residual: fc_q(S) + fc_v bias
        wk    = ld(offs["wk"])        # (d_in, dV)
        wv    = ld(offs["wv"])        # (d_in, dV)
        wo    = ld(offs["wo"])        # (dV, dV)
        bo    = ld(offs["bo"])        # (1, dV)

        # K/V projections. fc_k bias dropped exactly (softmax shift-invariant over keys);
        # fc_v bias already folded into q0r (softmax rows sum to 1).
        k = jnp.einsum("bnd,de->bne", x, wk, preferred_element_type=jnp.float32)  # (B,N,dV)
        v = jnp.einsum("bnd,de->bne", x, wv, preferred_element_type=jnp.float32)  # (B,N,dV)

        # Scores for ALL heads at once: row block h of qbd has only head-h columns nonzero,
        # so a single full-width contraction yields Q_h K_h^T / sqrt(dV) stacked over heads.
        qb = jnp.broadcast_to(qbd, (B, hns, dV))
        s = jnp.einsum("bqd,bkd->bqk", qb, k, preferred_element_type=jnp.float32)  # (B,H*ns,N)

        # One softmax over the whole batch x heads block; exact normalization.
        s = s - jnp.max(s, axis=-1, keepdims=True)
        p = jnp.exp(s)
        p = p / jnp.sum(p, axis=-1, keepdims=True)

        # P @ V for all heads, keep each row block's own head columns, then sum the H row
        # blocks back into seed rows via a tiny selection matmul (idle-MXU work; no
        # reshapes, transposes, head slices or sub-tile stores anywhere).
        of = jnp.einsum("bqk,bkd->bqd", p, v, preferred_element_type=jnp.float32) * cmask
        rs = jnp.broadcast_to(rsel, (B, ns, hns))
        o = jnp.einsum("bsq,bqd->bsd", rs, of, preferred_element_type=jnp.float32) + q0r

        # O = O + relu(fc_o(O))
        x = o + jax.nn.relu(
            jnp.einsum("bsd,de->bse", o, wo, preferred_element_type=jnp.float32) + bo)

    o_ref[...] = x                    # single store of the final result


def pma_stack_forward(data, packed_params, layer_specs):
    """data: (B, N0, d_in) -> (B, ns_last, dV_last); whole stack in one kernel launch."""
    B, N0, d0 = data.shape
    assert d0 == layer_specs[0]["d_in"], (d0, layer_specs[0]["d_in"])
    ns_last, dv_last = layer_specs[-1]["ns"], layer_specs[-1]["dV"]

    kernel = functools.partial(_pma_stack_kernel, layer_specs=layer_specs)
    return pl.pallas_call(
        kernel,
        out_shape=jax.ShapeDtypeStruct((B, ns_last, dv_last), jnp.float32),
        in_specs=[pl.BlockSpec(memory_space=pltpu.MemorySpace.VMEM),
                  pl.BlockSpec(memory_space=pltpu.MemorySpace.VMEM)],
        out_specs=pl.BlockSpec(memory_space=pltpu.MemorySpace.VMEM),
    )(data.astype(jnp.float32), packed_params)


# -----------------------------------------------------------------------------
# Parameter construction (mirrors PMA.__init__ shapes) + offline folding/packing
# -----------------------------------------------------------------------------
def _xavier(key, shape):
    bound = math.sqrt(6.0 / (shape[0] + shape[1]))
    return jax.random.uniform(key, shape, jnp.float32, -bound, bound)


def _linear_bias(key, fan_in, n):
    bound = 1.0 / math.sqrt(fan_in)
    return jax.random.uniform(key, (1, n), jnp.float32, -bound, bound)


def init_pma_params(key, d_in, d_out, num_seeds, num_heads):
    """PMA(dim_in=d_in, dim_V=d_out, num_seeds) with ln=False/cluster=False/mab_conv=None."""
    assert d_out % num_heads == 0, "dim_V must be divisible by num_heads"
    dh = d_out // num_heads
    ks = jax.random.split(key, 9)

    S  = _xavier(ks[0], (num_seeds, d_out))              # nn.Parameter(1, num_seeds, d_out)
    wq = _xavier(ks[1], (d_out, d_out)); bq = _linear_bias(ks[2], d_out, d_out)
    wk = _xavier(ks[3], (d_in, d_out));  bk = _linear_bias(ks[4], d_in, d_out)
    wv = _xavier(ks[5], (d_in, d_out));  bv = _linear_bias(ks[6], d_in, d_out)
    wo = _xavier(ks[7], (d_out, d_out)); bo = _linear_bias(ks[8], d_out, d_out)

    q0 = S @ wq + bq                                     # fc_q(S): batch-invariant

    # Offline block-diagonal multi-head layout (zero in-kernel head shuffles):
    head_of_col = jnp.arange(d_out) // dh                                   # (dV,)
    head_of_row = jnp.repeat(jnp.arange(num_heads), num_seeds)              # (H*ns,)
    cmask = (head_of_col[None, :] == head_of_row[:, None]).astype(jnp.float32)
    qbd = jnp.tile(q0, (num_heads, 1)) * cmask / math.sqrt(d_out)           # scaled + masked
    rsel = jnp.tile(jnp.eye(num_seeds, dtype=jnp.float32), (1, num_heads))  # (ns, H*ns)
    q0r = q0 + bv      # fc_v bias absorbed exactly (softmax rows sum to 1)
    # fc_k bias bk is NOT used by the kernel: it only shifts scores by a per-row constant
    # along the key axis and softmax is shift-invariant there (exact, not approximate).

    return dict(
        arrays=dict(qbd=qbd, cmask=cmask, rsel=rsel, q0r=q0r, wk=wk, wv=wv, wo=wo, bo=bo),
        raw=dict(q0=q0, wk=wk, bk=bk, wv=wv, bv=bv, wo=wo, bo=bo),
        ns=num_seeds, dV=d_out, d_in=d_in, hns=num_heads * num_seeds,
    )


def pack_param_stack(pools):
    """Pack every layer's parameters into one flat f32 (rows, width) buffer with
    8-row-aligned offsets -> one entry DMA instead of one per parameter."""
    width = max(a.shape[1] for p in pools for a in p["arrays"].values())
    blocks, specs, row = [], [], 0
    for p in pools:
        offs = {}
        for name in _PARAM_ORDER:
            a = p["arrays"][name]
            r, c = a.shape
            rp = ((r + 7) // 8) * 8                        # sublane-aligned start offsets
            blocks.append(jnp.zeros((rp, width), jnp.float32).at[:r, :c].set(a))
            offs[name] = (row, r, c)
            row += rp
        specs.append(dict(offs=offs, ns=p["ns"], dV=p["dV"], d_in=p["d_in"], hns=p["hns"]))
    return jnp.concatenate(blocks, axis=0), tuple(specs)


# -----------------------------------------------------------------------------
# Pure-JAX reference (per-head loops, explicit biases) for correctness checking
# -----------------------------------------------------------------------------
def pma_stack_reference(x, pools, num_heads):
    for p in pools:
        raw = p["raw"]
        dV = p["dV"]; dh = dV // num_heads
        K = x @ raw["wk"] + raw["bk"]
        V = x @ raw["wv"] + raw["bv"]
        q0 = raw["q0"]
        heads = []
        for h in range(num_heads):
            sl = slice(h * dh, (h + 1) * dh)
            s = jnp.einsum("sd,bnd->bsn", q0[:, sl], K[..., sl]) / math.sqrt(dV)
            a = jax.nn.softmax(s, axis=-1)
            heads.append(q0[:, sl] + jnp.einsum("bsn,bnd->bsd", a, V[..., sl]))
        o = jnp.concatenate(heads, axis=-1)
        x = o + jax.nn.relu(o @ raw["wo"] + raw["bo"])
    return x


# -----------------------------------------------------------------------------
# GraphTransformerEncode: builds the pool stack per get_pools() and runs forward()
# -----------------------------------------------------------------------------
class GraphTransformerEncode:
    def __init__(self, args, A, num_point, Time, key):
        self.args = args
        self.nhid = args["num_hidden"]
        self.pooling_ratio = args["pooling_ratio"]
        self.num_heads = args["multi_head"]
        self.model_sequence = args["model_string"].split("-")
        self.A = A

        _input_dim = args["input_dim"]
        _output_dim = self.nhid
        _num_nodes = ceil(self.pooling_ratio * num_point)
        _num_nodes_2 = _num_nodes

        self.pools = []
        keys = jax.random.split(key, len(self.model_sequence))
        for _index, _model_str in enumerate(self.model_sequence):
            if _index == len(self.model_sequence) - 1:
                _num_nodes = 1
            if _model_str == "GMPool_G":
                self.pools.append(init_pma_params(
                    keys[_index], _input_dim, _output_dim, _num_nodes, self.num_heads))
                _num_nodes = ceil(self.pooling_ratio * _num_nodes)
            elif _model_str == "GMPool_I":
                self.pools.append(init_pma_params(
                    keys[_index], _output_dim, _input_dim, _num_nodes, self.num_heads))
                _num_nodes = ceil(self.pooling_ratio * _num_nodes)
            else:
                raise ValueError(f"Model Name in Model String <{_model_str}> is Unknown")

        # Pack once at construction: a single parameter DMA per forward call.
        self.packed_params, self.layer_specs = pack_param_stack(self.pools)

    def forward(self, data, relrec_s1, relsend_s1, relrec_s2, relsend_s2,
                relrec_speed, relsend_speed):
        # relrec/relsend tensors only feed the GCN (mab_conv) path, which is disabled here
        # (mab_conv=None), matching the graph=None branch of the reference.
        return pma_stack_forward(data, self.packed_params, self.layer_specs)


# -----------------------------------------------------------------------------
if __name__ == "__main__":
    args = {
        "num_features": 16,
        "num_hidden": 32,
        "num_classes": 4,
        "pooling_ratio": 0.5,
        "dropout": 0.0,
        "ln": False,
        "multi_head": 4,
        "cluster": False,
        "mab_conv": None,
        "model_string": "GMPool_G-GMPool_I",
        "input_dim": 16,
    }

    batch = 2
    num_point = 8
    Time = 40

    key = jax.random.PRNGKey(0)
    k_param, k_data, k_rel = jax.random.split(key, 3)

    A = jnp.eye(num_point, dtype=jnp.float32)
    model = GraphTransformerEncode(args, A, num_point, Time, k_param)

    # data: (B, num_point, input_dim), channel-last
    data = jax.random.normal(k_data, (batch, num_point, args["input_dim"]), jnp.float32)

    # relation one-hot matrices (unused in the mab_conv=None path, passed for API parity)
    num_edges = num_point * (num_point - 1)
    rel = jax.random.normal(k_rel, (num_edges, num_point), jnp.float32)
    relrec_s1 = relsend_s1 = relrec_s2 = relsend_s2 = relrec_speed = relsend_speed = rel

    out = model.forward(data, relrec_s1, relsend_s1, relrec_s2, relsend_s2,
                        relrec_speed, relsend_speed)
    out = jax.block_until_ready(out)

    assert out.shape == (batch, 1, args["input_dim"]), out.shape
    assert bool(jnp.all(jnp.isfinite(out)))

    ref = pma_stack_reference(data, model.pools, model.num_heads)
    max_err = float(jnp.max(jnp.abs(out - ref)))
    assert jnp.allclose(out, ref, atol=2e-3, rtol=2e-3), max_err

    print("KERNEL_OK")
</pallas_src>

<mosaic_0001>
module attributes {stable_mosaic.version = 11 : i64} {
  func.func @_pma_stack_kernel(%arg0: memref<2x8x16xf32, #tpu.memory_space<vmem>>, %arg1: memref<240x32xf32, #tpu.memory_space<vmem>>, %arg2: memref<2x1x16xf32, #tpu.memory_space<vmem>>) attributes {dimension_semantics = [], scalar_prefetch = 0 : i64, scratch_operands = 0 : i64, tpu.core_type = #tpu.core_type<tc>} {
    %c0 = arith.constant 0 : index
    %c0_0 = arith.constant 0 : index
    %c0_1 = arith.constant 0 : index
    %0 = vector.load %arg0[%c0, %c0_0, %c0_1] : memref<2x8x16xf32, #tpu.memory_space<vmem>>, vector<2x8x16xf32>
    %c0_2 = arith.constant 0 : index
    %c0_3 = arith.constant 0 : index
    %1 = vector.load %arg1[%c0_2, %c0_3] : memref<240x32xf32, #tpu.memory_space<vmem>>, vector<16x32xf32>
    %c16 = arith.constant 16 : index
    %c0_4 = arith.constant 0 : index
    %2 = vector.load %arg1[%c16, %c0_4] : memref<240x32xf32, #tpu.memory_space<vmem>>, vector<16x32xf32>
    %c32 = arith.constant 32 : index
    %c0_5 = arith.constant 0 : index
    %3 = vector.load %arg1[%c32, %c0_5] : memref<240x32xf32, #tpu.memory_space<vmem>>, vector<4x16xf32>
    %c40 = arith.constant 40 : index
    %c0_6 = arith.constant 0 : index
    %4 = vector.load %arg1[%c40, %c0_6] : memref<240x32xf32, #tpu.memory_space<vmem>>, vector<4x32xf32>
    %c48 = arith.constant 48 : index
    %c0_7 = arith.constant 0 : index
    %5 = vector.load %arg1[%c48, %c0_7] : memref<240x32xf32, #tpu.memory_space<vmem>>, vector<16x32xf32>
    %c64 = arith.constant 64 : index
    %c0_8 = arith.constant 0 : index
    %6 = vector.load %arg1[%c64, %c0_8] : memref<240x32xf32, #tpu.memory_space<vmem>>, vector<16x32xf32>
    %c80 = arith.constant 80 : index
    %c0_9 = arith.constant 0 : index
    %7 = vector.load %arg1[%c80, %c0_9] : memref<240x32xf32, #tpu.memory_space<vmem>>, vector<32x32xf32>
    %c112 = arith.constant 112 : index
    %c0_10 = arith.constant 0 : index
    %8 = vector.load %arg1[%c112, %c0_10] : memref<240x32xf32, #tpu.memory_space<vmem>>, vector<1x32xf32>
    "tpu.trace_start"() <{level = 10 : i32, message = "bnd,de->bne"}> : () -> ()
    %cst = arith.constant dense<0.000000e+00> : vector<2x8x32xf32>
    %9 = tpu.matmul %0, %5, %cst {dimension_numbers = #tpu.dot_dimension_numbers<[2], [0], [0, 1], [1], [0, 0, 0, 1, 1, 1], [], []>} : vector<2x8x16xf32>, vector<16x32xf32>, vector<2x8x32xf32> -> vector<2x8x32xf32>
    %cst_11 = arith.constant dense<0.000000e+00> : vector<2x8x32xf32>
    %10 = tpu.matmul %0, %6, %cst_11 {dimension_numbers = #tpu.dot_dimension_numbers<[2], [0], [0, 1], [1], [0, 0, 0, 1, 1, 1], [], []>} : vector<2x8x16xf32>, vector<16x32xf32>, vector<2x8x32xf32> -> vector<2x8x32xf32>
    "tpu.trace_stop"() : () -> ()
    %11 = vector.shape_cast %1 : vector<16x32xf32> to vector<1x16x32xf32>
    %12 = vector.broadcast %11 : vector<1x16x32xf32> to vector<2x16x32xf32>
    "tpu.trace_start"() <{level = 10 : i32, message = "bqd,bkd->bqk"}> : () -> ()
    %cst_12 = arith.constant dense<0.000000e+00> : vector<2x16x8xf32>
    %13 = tpu.matmul %12, %9, %cst_12 {dimension_numbers = #tpu.dot_dimension_numbers<[2], [2], [1], [1], [0, 0, 0, 1, 1, 1], [0], [0]>} : vector<2x16x32xf32>, vector<2x8x32xf32>, vector<2x16x8xf32> -> vector<2x16x8xf32>
    "tpu.trace_stop"() : () -> ()
    %cst_13 = arith.constant dense<0xFF800000> : vector<2x16xf32>
    %14 = vector.multi_reduction <maximumf>, %13, %cst_13 [2] : vector<2x16x8xf32> to vector<2x16xf32>
    %15 = vector.shape_cast %14 : vector<2x16xf32> to vector<2x16x1xf32>
    %16 = vector.broadcast %15 : vector<2x16x1xf32> to vector<2x16x8xf32>
    %17 = arith.subf %13, %16 : vector<2x16x8xf32>
    %18 = math.exp %17 : vector<2x16x8xf32>
    %cst_14 = arith.constant dense<0.000000e+00> : vector<2x16xf32>
    %19 = vector.multi_reduction <add>, %18, %cst_14 [2] : vector<2x16x8xf32> to vector<2x16xf32>
    %20 = vector.shape_cast %19 : vector<2x16xf32> to vector<2x16x1xf32>
    %21 = vector.broadcast %20 : vector<2x16x1xf32> to vector<2x16x8xf32>
    %22 = arith.divf %18, %21 : vector<2x16x8xf32>
    "tpu.trace_start"() <{level = 10 : i32, message = "bqk,bkd->bqd"}> : () -> ()
    %cst_15 = arith.constant dense<0.000000e+00> : vector<2x16x32xf32>
    %23 = tpu.matmul %22, %10, %cst_15 {dimension_numbers = #tpu.dot_dimension_numbers<[2], [1], [1], [2], [0, 0, 0, 1, 1, 2], [0], [0]>} : vector<2x16x8xf32>, vector<2x8x32xf32>, vector<2x16x32xf32> -> vector<2x16x32xf32>
    "tpu.trace_stop"() : () -> ()
    %24 = vector.shape_cast %2 : vector<16x32xf32> to vector<1x16x32xf32>
    %25 = vector.broadcast %24 : vector<1x16x32xf32> to vector<2x16x32xf32>
    %26 = arith.mulf %23, %25 : vector<2x16x32xf32>
    %27 = vector.shape_cast %3 : vector<4x16xf32> to vector<1x4x16xf32>
    %28 = vector.broadcast %27 : vector<1x4x16xf32> to vector<2x4x16xf32>
    "tpu.trace_start"() <{level = 10 : i32, message = "bsq,bqd->bsd"}> : () -> ()
    %cst_16 = arith.constant dense<0.000000e+00> : vector<2x4x32xf32>
    %29 = tpu.matmul %28, %26, %cst_16 {dimension_numbers = #tpu.dot_dimension_numbers<[2], [1], [1], [2], [0, 0, 0, 1, 1, 2], [0], [0]>} : vector<2x4x16xf32>, vector<2x16x32xf32>, vector<2x4x32xf32> -> vector<2x4x32xf32>
    "tpu.trace_stop"() : () -> ()
    %30 = vector.shape_cast %4 : vector<4x32xf32> to vector<1x4x32xf32>
    %31 = vector.broadcast %30 : vector<1x4x32xf32> to vector<2x4x32xf32>
    %32 = arith.addf %29, %31 : vector<2x4x32xf32>
    "tpu.trace_start"() <{level = 10 : i32, message = "bsd,de->bse"}> : () -> ()
    %cst_17 = arith.constant dense<0.000000e+00> : vector<2x4x32xf32>
    %33 = tpu.matmul %32, %7, %cst_17 {dimension_numbers = #tpu.dot_dimension_numbers<[2], [0], [0, 1], [1], [0, 0, 0, 1, 1, 1], [], []>} : vector<2x4x32xf32>, vector<32x32xf32>, vector<2x4x32xf32> -> vector<2x4x32xf32>
    "tpu.trace_stop"() : () -> ()
    %34 = vector.shape_cast %8 : vector<1x32xf32> to vector<1x1x32xf32>
    %35 = vector.broadcast %34 : vector<1x1x32xf32> to vector<2x4x32xf32>
    %36 = arith.addf %33, %35 : vector<2x4x32xf32>
    %cst_18 = arith.constant 0.000000e+00 : f32
    %37 = vector.broadcast %cst_18 : f32 to vector<2x4x32xf32>
    %38 = arith.maximumf %36, %37 : vector<2x4x32xf32>
    %39 = arith.addf %32, %38 : vector<2x4x32xf32>
    %c120 = arith.constant 120 : index
    %c0_19 = arith.constant 0 : index
    %40 = vector.load %arg1[%c120, %c0_19] : memref<240x32xf32, #tpu.memory_space<vmem>>, vector<4x16xf32>
    %c128 = arith.constant 128 : index
    %c0_20 = arith.constant 0 : index
    %41 = vector.load %arg1[%c128, %c0_20] : memref<240x32xf32, #tpu.memory_space<vmem>>, vector<4x16xf32>
    %c136 = arith.constant 136 : index
    %c0_21 = arith.constant 0 : index
    %42 = vector.load %arg1[%c136, %c0_21] : memref<240x32xf32, #tpu.memory_space<vmem>>, vector<1x4xf32>
    %c144 = arith.constant 144 : index
    %c0_22 = arith.constant 0 : index
    %43 = vector.load %arg1[%c144, %c0_22] : memref<240x32xf32, #tpu.memory_space<vmem>>, vector<1x16xf32>
    %c152 = arith.constant 152 : index
    %c0_23 = arith.constant 0 : index
    %44 = vector.load %arg1[%c152, %c0_23] : memref<240x32xf32, #tpu.memory_space<vmem>>, vector<32x16xf32>
    %c184 = arith.constant 184 : index
    %c0_24 = arith.constant 0 : index
    %45 = vector.load %arg1[%c184, %c0_24] : memref<240x32xf32, #tpu.memory_space<vmem>>, vector<32x16xf32>
    %c216 = arith.constant 216 : index
    %c0_25 = arith.constant 0 : index
    %46 = vector.load %arg1[%c216, %c0_25] : memref<240x32xf32, #tpu.memory_space<vmem>>, vector<16x16xf32>
    %c232 = arith.constant 232 : index
    %c0_26 = arith.constant 0 : index
    %47 = vector.load %arg1[%c232, %c0_26] : memref<240x32xf32, #tpu.memory_space<vmem>>, vector<1x16xf32>
    "tpu.trace_start"() <{level = 10 : i32, message = "bnd,de->bne"}> : () -> ()
    %cst_27 = arith.constant dense<0.000000e+00> : vector<2x4x16xf32>
    %48 = tpu.matmul %39, %44, %cst_27 {dimension_numbers = #tpu.dot_dimension_numbers<[2], [0], [0, 1], [1], [0, 0, 0, 1, 1, 1], [], []>} : vector<2x4x32xf32>, vector<32x16xf32>, vector<2x4x16xf32> -> vector<2x4x16xf32>
    %cst_28 = arith.constant dense<0.000000e+00> : vector<2x4x16xf32>
    %49 = tpu.matmul %39, %45, %cst_28 {dimension_numbers = #tpu.dot_dimension_numbers<[2], [0], [0, 1], [1], [0, 0, 0, 1, 1, 1], [], []>} : vector<2x4x32xf32>, vector<32x16xf32>, vector<2x4x16xf32> -> vector<2x4x16xf32>
    "tpu.trace_stop"() : () -> ()
    %50 = vector.shape_cast %40 : vector<4x16xf32> to vector<1x4x16xf32>
    %51 = vector.broadcast %50 : vector<1x4x16xf32> to vector<2x4x16xf32>
    "tpu.trace_start"() <{level = 10 : i32, message = "bqd,bkd->bqk"}> : () -> ()
    %cst_29 = arith.constant dense<0.000000e+00> : vector<2x4x4xf32>
    %52 = tpu.matmul %51, %48, %cst_29 {dimension_numbers = #tpu.dot_dimension_numbers<[2], [2], [1], [1], [0, 0, 0, 1, 1, 1], [0], [0]>} : vector<2x4x16xf32>, vector<2x4x16xf32>, vector<2x4x4xf32> -> vector<2x4x4xf32>
    "tpu.trace_stop"() : () -> ()
    %cst_30 = arith.constant dense<0xFF800000> : vector<2x4xf32>
    %53 = vector.multi_reduction <maximumf>, %52, %cst_30 [2] : vector<2x4x4xf32> to vector<2x4xf32>
    %54 = vector.shape_cast %53 : vector<2x4xf32> to vector<2x4x1xf32>
    %55 = vector.broadcast %54 : vector<2x4x1xf32> to vector<2x4x4xf32>
    %56 = arith.subf %52, %55 : vector<2x4x4xf32>
    %57 = math.exp %56 : vector<2x4x4xf32>
    %cst_31 = arith.constant dense<0.000000e+00> : vector<2x4xf32>
    %58 = vector.multi_reduction <add>, %57, %cst_31 [2] : vector<2x4x4xf32> to vector<2x4xf32>
    %59 = vector.shape_cast %58 : vector<2x4xf32> to vector<2x4x1xf32>
    %60 = vector.broadcast %59 : vector<2x4x1xf32> to vector<2x4x4xf32>
    %61 = arith.divf %57, %60 : vector<2x4x4xf32>
    "tpu.trace_start"() <{level = 10 : i32, message = "bqk,bkd->bqd"}> : () -> ()
    %cst_32 = arith.constant dense<0.000000e+00> : vector<2x4x16xf32>
    %62 = tpu.matmul %61, %49, %cst_32 {dimension_numbers = #tpu.dot_dimension_numbers<[2], [1], [1], [2], [0, 0, 0, 1, 1, 2], [0], [0]>} : vector<2x4x4xf32>, vector<2x4x16xf32>, vector<2x4x16xf32> -> vector<2x4x16xf32>
    "tpu.trace_stop"() : () -> ()
    %63 = vector.shape_cast %41 : vector<4x16xf32> to vector<1x4x16xf32>
    %64 = vector.broadcast %63 : vector<1x4x16xf32> to vector<2x4x16xf32>
    %65 = arith.mulf %62, %64 : vector<2x4x16xf32>
    %66 = vector.shape_cast %42 : vector<1x4xf32> to vector<1x1x4xf32>
    %67 = vector.broadcast %66 : vector<1x1x4xf32> to vector<2x1x4xf32>
    "tpu.trace_start"() <{level = 10 : i32, message = "bsq,bqd->bsd"}> : () -> ()
    %cst_33 = arith.constant dense<0.000000e+00> : vector<2x1x16xf32>
    %68 = tpu.matmul %67, %65, %cst_33 {dimension_numbers = #tpu.dot_dimension_numbers<[2], [1], [1], [2], [0, 0, 0, 1, 1, 2], [0], [0]>} : vector<2x1x4xf32>, vector<2x4x16xf32>, vector<2x1x16xf32> -> vector<2x1x16xf32>
    "tpu.trace_stop"() : () -> ()
    %69 = vector.shape_cast %43 : vector<1x16xf32> to vector<1x1x16xf32>
    %70 = vector.broadcast %69 : vector<1x1x16xf32> to vector<2x1x16xf32>
    %71 = arith.addf %68, %70 : vector<2x1x16xf32>
    "tpu.trace_start"() <{level = 10 : i32, message = "bsd,de->bse"}> : () -> ()
    %cst_34 = arith.constant dense<0.000000e+00> : vector<2x1x16xf32>
    %72 = tpu.matmul %71, %46, %cst_34 {dimension_numbers = #tpu.dot_dimension_numbers<[2], [0], [0, 1], [1], [0, 0, 0, 1, 1, 1], [], []>} : vector<2x1x16xf32>, vector<16x16xf32>, vector<2x1x16xf32> -> vector<2x1x16xf32>
    "tpu.trace_stop"() : () -> ()
    %73 = vector.shape_cast %47 : vector<1x16xf32> to vector<1x1x16xf32>
    %74 = vector.broadcast %73 : vector<1x1x16xf32> to vector<2x1x16xf32>
    %75 = arith.addf %72, %74 : vector<2x1x16xf32>
    %cst_35 = arith.constant 0.000000e+00 : f32
    %76 = vector.broadcast %cst_35 : f32 to vector<2x1x16xf32>
    %77 = arith.maximumf %75, %76 : vector<2x1x16xf32>
    %78 = arith.addf %71, %77 : vector<2x1x16xf32>
    %c0_36 = arith.constant 0 : index
    %c0_37 = arith.constant 0 : index
    %c0_38 = arith.constant 0 : index
    %79 = vector.load %arg2[%c0_36, %c0_37, %c0_38] : memref<2x1x16xf32, #tpu.memory_space<vmem>>, vector<2x1x16xf32>
    tpu.vector_store %arg2[%c0_36, %c0_37, %c0_38], %78 {strides = array<i32>} : memref<2x1x16xf32, #tpu.memory_space<vmem>>, vector<2x1x16xf32>,
    return
  }
}

</mosaic_0001>

<bundles_post_ra>
// kernel: tpu_custom_call.1
= control target key start
LH: loop header
LB: loop body
LE: loop exit
PB: predicated region body
PF: predicated region fallthrough
CT: control target
= control target key end

     0   :  { %vm29_vm0 = vcmask 130048   ;;  %s2070_s0 = inlined_call_operand.vmem [shape: f32[2,8,16], index: 0, kind: input, shape index: {}]   ;;  %s2071_s1 = inlined_call_operand.vmem [shape: f32[240,32], index: 1, kind: input, shape index: {}]   ;;  %s2072_s2 = inlined_call_operand.hbm [shape: f32[2,1,16], index: 2, kind: output, shape index: {}]  }
   0x1   :  { %v20_v0 = vld [vmem:[%s2071_s1 + $0x30] sm:$0xff]  ;;  %v21_v1 = vld [vmem:[%s2071_s1 + $0x38] sm:$0xff]  ;;  %v12_v2 = vld [vmem:[%s2070_s0] sm:$0xff] }
   0x2   :  { %v1765_v3 = vpack.c.bf16 %v21_v1, %v20_v0  ;;  %1651 = vmatprep.mubr.msk.f32.mxu0 %vm29_vm0, %v12_v2  ;;  %v22_v4 = vld [vmem:[%s2071_s1 + $0x40] sm:$0xff]  ;;  %v23_v5 = vld [vmem:[%s2071_s1 + $0x48] sm:$0xff]  ;;  %1658 = vmatprep.mubr.msk.f32.mxu1 %vm29_vm0, %v12_v2 }
   0x3   :  { %v1769_v6 = vpack.c.bf16 %v23_v5, %v22_v4 }
   0x4   :  { %7 = vsyncpa [#allocation3], 0  ;;  %1766 = vmatprep.subr.bf16.mxu0 %v1765_v3  ;;  %v13_v7 = vld [vmem:[%s2070_s0 + $0x8] sm:$0xff]  ;;  %vm186_vm1 = vcmask 261120   ;;  %v14_v8 = vld [vmem:[%s2071_s1] sm:$0xff]  ;;  %vm349_vm2 = vcmask 64512  }
   0x5   :  { %1768 = vmatpush3.bf16.msra.mxu0 %v1765_v3  ;;  %1770 = vmatprep.subr.bf16.mxu1 %v1769_v6  ;;  %v15_v13 = vld [vmem:[%s2071_s1 + $0x8] sm:$0xff]  ;;  %v1855_v54 = vmov 0.0|0.0   ;;  %vm1856_vm3 = vmmov 0   ;;  %v1857_v55 = vmov 0.0   ;;  %v17_v56 = vld [vmem:[%s2071_s1 + $0x18] sm:$0xff]  ;;  %v16_v57 = vld [vmem:[%s2071_s1 + $0x10] sm:$0xff] }
   0x6   :  { %1772 = vmatpush3.bf16.msra.mxu1 %v1769_v6  ;;  %v24_v63 = vld [vmem:[%s2071_s1 + $0x50] sm:$0xff]  ;;  %v25_v0 = vld [vmem:[%s2071_s1 + $0x58] sm:$0xff]  ;;  %v18_v5 = vld [vmem:[%s2071_s1 + $0x20] sm:$0xf]  ;;  %vm1130_vm4 = vcmask 1043456   ;;  %vm1103_vm5 = vcmask 27648  }
   0x7   :  { %v1780_v6 = vpack.c.bf16 %v25_v0, %v24_v63  ;;  %vm1126_vm6 = vcmask 31744   ;;  %vm1432_vm7 = vcmask 1041409   ;;  %vm1539_vm8 = vcmask 122880   ;;  %s1859_s15 = smov [#allocation2]  }
   0x8   :  { %1652 = vmatmul.mubr.msk.f32.vlgmr.msra.gmra.mrb[0].mxu0 %vm29_vm0, %v13_v7  ;;  %s1547_s16 = sshll.u32 %s1859_s15, 4  ;;  %s1548_s16 = int_to_ptr.vmem [resolvable:$true] %s1547_s16 }
   0x9   :  { %1659 = vmatmul.mubr.msk.f32.vlgmr.msra.gmra.mrb[0].mxu1 %vm29_vm0, %v13_v7  ;;  %1663 = vmatprep.mubr.msk.f32.mxu0 %vm186_vm1, %v14_v8  ;;  %p1836_p1 = scmp.lt.s32.totalorder %s1548_s16, %s1548_s16 }
   0xa   :  { %1668 = vmatprep.mubr.msk.f32.mxu1 %vm186_vm1, %v14_v8  ;;  %v26_v8 = vld [vmem:[%s2071_s1 + $0x60] sm:$0xff] }
  0xdb   :  { %v1653_v9 = vpop.f32.mrb[0].mxu0 }
  0xdc   :  { %v102_v10 = vpop.f32.mrb[1].mxu0  ;;  %1666 = vmatprep.subr.msk.mxu1 %vm186_vm1, %v1653_v9  ;;  %v1660_v11 = vpop.f32.mrb[0].mxu1 }
  0xdd   :  { %1661 = vmatprep.subr.msk.mxu0 %vm186_vm1, %v102_v10  ;;  %1667 = vmatpush3.xpose.msk.msra.mxu1 %vm186_vm1, %v1653_v9  ;;  %v177_v12 = vpop.f32.mrb[1].mxu1  ;;  %v27_v9 = vld [vmem:[%s2071_s1 + $0x68] sm:$0xff] }
  0xde   :  { %1662 = vmatpush3.xpose.msk.msra.mxu0 %vm186_vm1, %v102_v10  ;;  %1676 = vmatprep.subr.mxu1 %v1660_v11  ;;  %v1783_v10 = vpack.c.bf16 %v27_v9, %v26_v8  ;;  %v793_v9 = vld [vmem:[%s2071_s1 + $0x80] sm:$0xf] }
  0xdf   :  { %1671 = vmatprep.subr.mxu0 %v177_v12 }
  0xe0   :  { %1669 = vmatmul.mubr.msk.f32.vlgmr.msra.gmra.mrb[2].mxu1 %vm186_vm1, %v15_v13 }
  0xe1   :  { %1664 = vmatmul.mubr.msk.f32.vlgmr.msra.gmra.mrb[2].mxu0 %vm186_vm1, %v15_v13  ;;  %1677 = vmatpush3.msra.mxu1 %v1660_v11  ;;  %v19_v11 = vld [vmem:[%s2071_s1 + $0x28] sm:$0xf] }
  0xe2   :  { %1672 = vmatpush3.msra.mxu0 %v177_v12  ;;  %1776 = vmatprep.subr.bf16.mxu1 %v1855_v54 }
  0xe3   :  { %1773 = vmatprep.subr.bf16.mxu0 %v1855_v54 }
 0x1b3   :  { %v1670_v14 = vpop.f32.mrb[2].mxu1 }
 0x1b4   :  { %v1665_v15 = vpop.f32.mrb[2].mxu0  ;;  %v340_v16 = vpop.f32.mrb[3].mxu1  ;;  %v359_v20 = vsel %vm349_vm2, %v1670_v14, -inf }
 0x1b5   :  { %v262_v17 = vpop.f32.mrb[3].mxu0  ;;  %v353_v18 = vsel %vm349_vm2, %v1665_v15, -inf  ;;  %v356_v21 = vsel %vm349_vm2, %v340_v16, -inf }
 0x1b6   :  { %354 = vmax.xlane.f32.xlu1 %v353_v18  ;;  %v350_v19 = vsel %vm349_vm2, %v262_v17, -inf }
 0x1b7   :  { %351 = vmax.xlane.f32.xlu0 %v350_v19  ;;  %v796_v19 = vld [vmem:[%s2071_s1 + $0x98] sm:$0xff] }
 0x1ba   :  { %360 = vmax.xlane.f32.xlu1 %v359_v20  ;;  %v797_v20 = vld [vmem:[%s2071_s1 + $0xa0] sm:$0xff] }
 0x1bb   :  { %357 = vmax.xlane.f32.xlu0 %v356_v21  ;;  %v800_v21 = vld [vmem:[%s2071_s1 + $0xb8] sm:$0xff] }
 0x243   :  { %v355_v22 = vpop.xlane.xlu1 %354 }
 0x244   :  { %v363_v23 = vsub.f32 %v1665_v15, %v355_v22  ;;  %v352_v24 = vpop.xlane.xlu0 %351  ;;  %v1786_v22 = vpack.c.bf16 %v797_v20, %v796_v19 }
 0x245   :  { %v362_v25 = vsub.f32 %v262_v17, %v352_v24 }
 0x246   :  { %v368_v26 = vmul.f32 1.442695, %v363_v23  ;;  %v801_v23 = vld [vmem:[%s2071_s1 + $0xc0] sm:$0xff] }
 0x247   :  { %v366_v27 = vmul.f32 1.442695, %v362_v25  ;;  %v361_v28 = vpop.xlane.xlu1 %360  ;;  %v1792_v24 = vpack.c.bf16 %v801_v23, %v800_v21  ;;  %v798_v25 = vld [vmem:[%s2071_s1 + $0xa8] sm:$0xff] }
 0x248   :  { %v365_v29 = vsub.f32 %v1670_v14, %v361_v28  ;;  %v358_v30 = vpop.xlane.xlu0 %357 }
 0x249   :  { %1807 = vpow2.f32 %v366_v27  ;;  %v364_v31 = vsub.f32 %v340_v16, %v358_v30  ;;  %v802_v27 = vld [vmem:[%s2071_s1 + $0xc8] sm:$0xff] }
 0x24a   :  { %1809 = vpow2.f32 %v368_v26  ;;  %v372_v32 = vmul.f32 1.442695, %v365_v29  ;;  %v799_v26 = vld [vmem:[%s2071_s1 + $0xb0] sm:$0xff] }
 0x24b   :  { %v370_v33 = vmul.f32 1.442695, %v364_v31  ;;  %v1789_v28 = vpack.c.bf16 %v799_v26, %v798_v25  ;;  %v803_v29 = vld [vmem:[%s2071_s1 + $0xd0] sm:$0xff] }
 0x24c   :  { %v1795_v30 = vpack.c.bf16 %v803_v29, %v802_v27  ;;  %v1574_v31 = vld [vmem:[%s2071_s1 + $0x70] ss:$0 sm:$0xff]  ;;  %v806_v27 = vld [vmem:[%s2071_s1 + $0xe8] sm:$0x1] }
 0x24d   :  { %1811 = vpow2.f32 %v370_v33 }
 0x24e   :  { %1813 = vpow2.f32 %v372_v32  ;;  %v711_v32 = vcombine.low %v1574_v31, %v1574_v31  ;;  %v1435_v31 = vrot.slane %v806_v27, 7 }
 0x253   :  { %v1808_v34 = vpop.eup %1807 }
 0x254   :  { %v374_v35 = vsel %vm349_vm2, %v1808_v34, 0.0  ;;  %v1810_v36 = vpop.eup %1809 }
 0x255   :  { %375 = vadd.xlane.f32.xlu0 %v374_v35  ;;  %v377_v38 = vsel %vm349_vm2, %v1810_v36, 0.0 }
 0x257   :  { %v1812_v37 = vpop.eup %1811 }
 0x258   :  { %v380_v39 = vsel %vm349_vm2, %v1812_v37, 0.0  ;;  %v1814_v40 = vpop.eup %1813 }
 0x259   :  { %378 = vadd.xlane.f32.xlu0 %v377_v38  ;;  %381 = vadd.xlane.f32.xlu1 %v380_v39  ;;  %v383_v41 = vsel %vm349_vm2, %v1814_v40, 0.0 }
 0x25d   :  { %384 = vadd.xlane.f32.xlu1 %v383_v41 }
 0x2e2   :  { %v376_v42 = vpop.xlane.xlu0 %375 }
 0x2e3   :  { %1815 = vrcp.f32 %v376_v42 }
 0x2e6   :  { %v382_v43 = vpop.xlane.xlu1 %381  ;;  %v379_v44 = vpop.xlane.xlu0 %378 }
 0x2e7   :  { %1817 = vrcp.f32 %v382_v43 }
 0x2e8   :  { %1819 = vrcp.f32 %v379_v44 }
 0x2ea   :  { %v385_v45 = vpop.xlane.xlu1 %384 }
 0x2eb   :  { %1821 = vrcp.f32 %v385_v45 }
 0x2ed   :  { %v1816_v46 = vpop.eup %1815 }
 0x2ee   :  { %v387_v47 = vmul.f32 %v1816_v46, %v1808_v34  ;;  %v792_v46 = vld [vmem:[%s2071_s1 + $0x78] sm:$0xf] }
 0x2f0   :  { %1673 = vmatprep.mubr.msk.f32.mxu0 %vm349_vm2, %v387_v47 }
 0x2f1   :  { %v1818_v48 = vpop.eup %1817 }
 0x2f2   :  { %v1820_v49 = vpop.eup %1819  ;;  %v391_v50 = vmul.f32 %v1818_v48, %v1812_v37 }
 0x2f3   :  { %v389_v51 = vmul.f32 %v1820_v49, %v1810_v36 }
 0x2f4   :  { %1678 = vmatprep.mubr.msk.f32.mxu1 %vm349_vm2, %v391_v50 }
 0x2f5   :  { %v1822_v52 = vpop.eup %1821  ;;  %1674 = vmatmul.mubr.msk.f32.vlgmr.msra.gmra.mrb[4].mxu0 %vm349_vm2, %v389_v51 }
 0x2f6   :  { %v393_v53 = vmul.f32 %v1822_v52, %v1814_v40  ;;  %1685 = vmatprep.mubr.msk.f32.mxu0 %vm1856_vm3, %v1857_v55 }
 0x2f8   :  { %1679 = vmatmul.mubr.msk.f32.vlgmr.msra.gmra.mrb[4].mxu1 %vm349_vm2, %v393_v53 }
 0x2f9   :  { %1692 = vmatprep.mubr.msk.f32.mxu1 %vm1856_vm3, %v1857_v55 }
 0x3c8   :  { %v1675_v58 = vpop.f32.mrb[4].mxu0 }
 0x3c9   :  { %v557_v59 = vmul.f32 %v1675_v58, %v17_v56  ;;  %v466_v60 = vpop.f32.mrb[5].mxu0 }
 0x3ca   :  { %v556_v61 = vmul.f32 %v466_v60, %v16_v57 }
 0x3cb   :  { %v1680_v62 = vpop.f32.mrb[4].mxu1 }
 0x3cc   :  { %v1774_v1 = vpack.c.bf16 %v557_v59, %v556_v61  ;;  %v559_v2 = vmul.f32 %v1680_v62, %v17_v56  ;;  %v547_v3 = vpop.f32.mrb[5].mxu1 }
 0x3cd   :  { %v558_v4 = vmul.f32 %v547_v3, %v16_v57 }
 0x3ce   :  { %1775 = vmatpush3.bf16.msra.mxu0 %v1774_v1 }
 0x3cf   :  { %v1777_v7 = vpack.c.bf16 %v559_v2, %v558_v4  ;;  %1779 = vmatprep.subr.bf16.mxu0 %v1855_v54 }
 0x3d1   :  { %1778 = vmatpush3.bf16.msra.mxu1 %v1777_v7  ;;  %1686 = vmatmul.mubr.msk.f32.vlgmr.msra.gmra.mrb[6].mxu0 %vm29_vm0, %v18_v5 }
 0x3d2   :  { %1781 = vmatpush3.bf16.msra.mxu0 %v1780_v6  ;;  %1703 = vmatprep.mubr.msk.f32.mxu0 %vm1856_vm3, %v1857_v55 }
 0x3d3   :  { %1782 = vmatprep.subr.bf16.mxu0 %v1855_v54  ;;  %1785 = vmatprep.subr.bf16.mxu1 %v1855_v54 }
 0x3d4   :  { %1693 = vmatmul.mubr.msk.f32.vlgmr.msra.gmra.mrb[6].mxu1 %vm29_vm0, %v18_v5 }
 0x3d5   :  { %1714 = vmatprep.mubr.msk.f32.mxu1 %vm1856_vm3, %v1857_v55  ;;  %1787 = vmatpush3.bf16.msra.mxu1 %v1786_v22 }
 0x3d6   :  { %1784 = vmatpush3.bf16.msra.mxu0 %v1783_v10  ;;  %1788 = vmatprep.subr.bf16.mxu1 %v1855_v54 }
 0x3d7   :  { %1791 = vmatprep.subr.bf16.mxu0 %v1855_v54 }
 0x3d9   :  { %1790 = vmatpush3.bf16.msra.mxu1 %v1789_v28  ;;  %v1858_v28 = vmov 1966171168  }
 0x3da   :  { %1728 = vmatprep.subr.mxu1 %v1857_v55  ;;  %v1512_v29 = vunpack.c.l.s4 %v1858_v28 }
 0x4a4   :  { %v629_v12 = vpop.f32.mrb[6].mxu0 }
 0x4a5   :  { %v1687_v13 = vpop.f32.mrb[7].mxu0  ;;  %v630_v14 = vadd.f32 %v629_v12, %v19_v11 }
 0x4a6   :  { %v794_v13 = vld [vmem:[%s2071_s1 + $0x88] sm:$0x1] }
 0x4a7   :  { %v699_v15 = vpop.f32.mrb[6].mxu1 }
 0x4a8   :  { %v700_v16 = vadd.f32 %v699_v15, %v19_v11  ;;  %v1694_v17 = vpop.f32.mrb[7].mxu1 }
 0x4a9   :  { %v804_v17 = vld [vmem:[%s2071_s1 + $0xd8] sm:$0xff] }
 0x4aa   :  { %v709_v18 = vcombine.low %v630_v14, %v700_v16 }
 0x4ac   :  { %1704 = vmatmul.mubr.msk.f32.vlgmr.msra.gmra.mrb[8].mxu0 %vm186_vm1, %v709_v18  ;;  %v805_v18 = vld [vmem:[%s2071_s1 + $0xe0] sm:$0xff] }
 0x4ad   :  { %1725 = vmatprep.mubr.msk.f32.mxu0 %vm1856_vm3, %v1857_v55  ;;  %1793 = vmatpush3.bf16.msra.mxu0 %v1792_v24  ;;  %v1798_v19 = vpack.c.bf16 %v805_v18, %v804_v17 }
 0x4ae   :  { %1794 = vmatprep.subr.bf16.mxu0 %v1855_v54 }
 0x4b1   :  { %1796 = vmatpush3.bf16.msra.mxu0 %v1795_v30  ;;  %v1514_v30 = vlaneseq }
 0x4b2   :  { %1738 = vmatprep.subr.mxu0 %v1857_v55 }
 0x57f   :  { %v781_v33 = vpop.f32.mrb[8].mxu0 }
 0x580   :  { %v782_v34 = vadd.f32 %v781_v33, %v711_v32  ;;  %v1705_v35 = vpop.f32.mrb[9].mxu0  ;;  %v1513_v32 = vunpack.c.0.s8 %v1512_v29  ;;  %v1515_v33 = vshrl.u32 %v1514_v30, 7 }
 0x582   :  { %v786_v36 = vcombine.high %v782_v34, %v782_v34  ;;  %v788_v37 = vmax.f32 %v782_v34, 0.0  ;;  %v1436_v34 = vsel %vm1432_vm7, %v1435_v31, %v806_v27  ;;  %v1516_v35 = vsub.s32 %v1513_v32, %v1515_v33 }
 0x584   :  { %v789_v38 = vmax.f32 %v786_v36, 0.0  ;;  %v790_v39 = vadd.f32 %v788_v37, %v630_v14 }
 0x586   :  { %v791_v40 = vadd.f32 %v789_v38, %v700_v16 }
 0x588   :  { %v809_v41 = vcombine.low %v790_v39, %v791_v40 }
 0x58a   :  { %1715 = vmatmul.mubr.msk.f32.vlgmr.msra.gmra.mrb[8].mxu1 %vm186_vm1, %v809_v41  ;;  %1726 = vmatmul.mubr.msk.f32.vlgmr.msra.gmra.mrb[10].mxu0 %vm186_vm1, %v809_v41 }
 0x58b   :  { %1730 = vmatprep.mubr.msk.f32.mxu1 %vm1856_vm3, %v1857_v55  ;;  %1740 = vmatprep.mubr.msk.f32.mxu0 %vm1856_vm3, %v1857_v55 }
 0x65d   :  { %v878_v42 = vpop.f32.mrb[8].mxu1  ;;  %v950_v43 = vpop.f32.mrb[10].mxu0 }
 0x65e   :  { %v1716_v44 = vpop.f32.mrb[9].mxu1  ;;  %v1727_v45 = vpop.f32.mrb[11].mxu0  ;;  %1729 = vmatpush3.xpose.msk.msra.mxu1 %vm29_vm0, %v878_v42  ;;  %1739 = vmatpush3.msk.msra.mxu0 %vm1130_vm4, %v950_v43  ;;  %v883_v47 = vcombine.high %v878_v42, %v878_v42  ;;  %v955_v48 = vcombine.high %v950_v43, %v950_v43 }
 0x65f   :  { %1733 = vmatprep.subr.mxu1 %v1857_v55  ;;  %1748 = vmatprep.subr.mxu0 %v1857_v55 }
 0x661   :  { %1731 = vmatmul.mubr.msk.f32.vlgmr.msra.gmra.mrb[10].mxu1 %vm29_vm0, %v792_v46 }
 0x662   :  { %1734 = vmatpush3.xpose.msk.msra.mxu1 %vm29_vm0, %v883_v47  ;;  %1735 = vmatprep.mubr.msk.f32.mxu1 %vm1856_vm3, %v1857_v55 }
 0x663   :  { %1743 = vmatprep.subr.mxu1 %v1857_v55 }
 0x665   :  { %1736 = vmatmul.mubr.msk.f32.vlgmr.msra.gmra.mrb[12].mxu1 %vm29_vm0, %v792_v46 }
 0x666   :  { %1744 = vmatpush3.msk.msra.mxu1 %vm1130_vm4, %v955_v48  ;;  %1745 = vmatprep.mubr.msk.f32.mxu1 %vm1856_vm3, %v1857_v55 }
 0x667   :  { %1753 = vmatprep.subr.mxu1 %v1857_v55 }
 0x734   :  { %v1027_v49 = vpop.f32.mrb[10].mxu1 }
 0x735   :  { %v1732_v50 = vpop.f32.mrb[11].mxu1  ;;  %v1104_v51 = vsel %vm1103_vm5, %v1027_v49, -inf }
 0x736   :  { %1105 = vmax.xlane.f32.xlu1 %v1104_v51 }
 0x738   :  { %v1099_v52 = vpop.f32.mrb[12].mxu1 }
 0x739   :  { %v1737_v53 = vpop.f32.mrb[13].mxu1  ;;  %v1107_v56 = vsel %vm1103_vm5, %v1099_v52, -inf }
 0x73a   :  { %1108 = vmax.xlane.f32.xlu0 %v1107_v56 }
 0x7c3   :  { %v1106_v57 = vpop.xlane.xlu1 %1105 }
 0x7c4   :  { %v1110_v58 = vsub.f32 %v1027_v49, %v1106_v57 }
 0x7c6   :  { %v1112_v59 = vmul.f32 1.442695, %v1110_v58 }
 0x7c7   :  { %v1109_v60 = vpop.xlane.xlu0 %1108 }
 0x7c8   :  { %1823 = vpow2.f32 %v1112_v59  ;;  %v1111_v61 = vsub.f32 %v1099_v52, %v1109_v60 }
 0x7ca   :  { %v1114_v62 = vmul.f32 1.442695, %v1111_v61 }
 0x7cc   :  { %1825 = vpow2.f32 %v1114_v62 }
 0x7d2   :  { %v1824_v63 = vpop.eup %1823 }
 0x7d3   :  { %v1116_v0 = vsel %vm1103_vm5, %v1824_v63, 0.0 }
 0x7d4   :  { %1117 = vadd.xlane.f32.xlu1 %v1116_v0 }
 0x7d6   :  { %v1826_v1 = vpop.eup %1825 }
 0x7d7   :  { %v1119_v2 = vsel %vm1103_vm5, %v1826_v1, 0.0 }
 0x7d8   :  { %1120 = vadd.xlane.f32.xlu0 %v1119_v2 }
 0x861   :  { %v1118_v3 = vpop.xlane.xlu1 %1117 }
 0x862   :  { %1827 = vrcp.f32 %v1118_v3 }
 0x865   :  { %v1121_v4 = vpop.xlane.xlu0 %1120 }
 0x866   :  { %1829 = vrcp.f32 %v1121_v4 }
 0x86c   :  { %v1828_v5 = vpop.eup %1827 }
 0x86d   :  { %v1123_v6 = vmul.f32 %v1828_v5, %v1824_v63 }
 0x86f   :  { %1741 = vmatmul.mubr.msk.f32.vlgmr.msra.gmra.mrb[12].mxu0 %vm1126_vm6, %v1123_v6 }
 0x870   :  { %v1830_v7 = vpop.eup %1829  ;;  %1750 = vmatprep.mubr.msk.f32.mxu0 %vm1856_vm3, %v1857_v55 }
 0x871   :  { %v1125_v8 = vmul.f32 %v1830_v7, %v1826_v1 }
 0x873   :  { %1746 = vmatmul.mubr.msk.f32.vlgmr.msra.gmra.mrb[14].mxu1 %vm1126_vm6, %v1125_v8 }
 0x874   :  { %1755 = vmatprep.mubr.msk.f32.mxu1 %vm1856_vm3, %v1857_v55 }
 0x942   :  { %v1199_v10 = vpop.f32.mrb[12].mxu0 }
 0x943   :  { %v1278_v11 = vmul.f32 %v1199_v10, %v793_v9  ;;  %v1742_v12 = vpop.f32.mrb[13].mxu0 }
 0x945   :  { %1749 = vmatpush3.msk.msra.mxu0 %vm1130_vm4, %v1278_v11 }
 0x946   :  { %v1274_v14 = vpop.f32.mrb[14].mxu1  ;;  %1751 = vmatmul.mubr.msk.f32.vlgmr.msra.gmra.mrb[14].mxu0 %vm1126_vm6, %v794_v13  ;;  %1797 = vmatprep.subr.bf16.mxu0 %v1855_v54 }
 0x947   :  { %v1279_v15 = vmul.f32 %v1274_v14, %v793_v9  ;;  %v1747_v16 = vpop.f32.mrb[15].mxu1  ;;  %1762 = vmatprep.mubr.msk.f32.mxu0 %vm1856_vm3, %v1857_v55  ;;  %1799 = vmatpush3.bf16.msra.mxu0 %v1798_v19  ;;  %v795_v55 = vld [vmem:[%s2071_s1 + $0x90] sm:$0x1]  ;;  %s1831_s1 = scalar_lea.vmem %s1548_s16, 32 }
 0x948   :  { %p1832_p0 = scmp.ne.s32.totalorder %s1548_s16, %s1831_s1  ;;  %p1837_p2 = scmp.lt.s32.totalorder %s1831_s1, %s1831_s1 }
 0x949   :  { %1754 = vmatpush3.msk.msra.mxu1 %vm1130_vm4, %v1279_v15 }
 0x94a   :  { %1756 = vmatmul.mubr.msk.f32.vlgmr.msra.gmra.mrb[16].mxu1 %vm1126_vm6, %v794_v13  ;;  %p1838_p3 = por %p1837_p2, %p1836_p1 }
 0x94c   :  { %p1839_p4 = pnand %p1838_p3, %p1832_p0 }
 0xa19   :  { %v1352_v54 = vpop.f32.mrb[14].mxu0 }
 0xa1a   :  { %v1752_v20 = vpop.f32.mrb[15].mxu0  ;;  %v1353_v23 = vadd.f32 %v1352_v54, %v795_v55 }
 0xa1d   :  { %v1425_v21 = vpop.f32.mrb[16].mxu1 }
 0xa1e   :  { %v1426_v22 = vadd.f32 %v1425_v21, %v795_v55  ;;  %v1757_v24 = vpop.f32.mrb[17].mxu1 }
 0xa20   :  { %v1431_v25 = vrot.slane %v1426_v22, 7 }
 0xa22   :  { %v1433_v26 = vsel %vm1432_vm7, %v1431_v25, %v1353_v23 }
 0xa23   :  { %1763 = vmatmul.mubr.msk.f32.vlgmr.msra.gmra.mrb[16].mxu0 %vm29_vm0, %v1433_v26 }
 0xaf6   :  { %v1506_v36 = vpop.f32.mrb[16].mxu0 }
 0xaf7   :  { %v1507_v37 = vadd.f32 %v1506_v36, %v1436_v34  ;;  %v1764_v38 = vpop.f32.mrb[17].mxu0 }
 0xaf9   :  { %v1517_v39 = vrot.slane %v1507_v37, %v1516_v35 }
 0xafb   :  { %v1518_v40 = vcombine.high %v1517_v39, %v1517_v39  ;;  %v1525_v41 = vrot.slane %v1517_v39, %v1516_v35 }
 0xafd   :  { %v1532_v42 = vrot.slane %v1518_v40, %v1516_v35  ;;  %v1535_v43 = vmax.f32 %v1525_v41, 0.0 }
 0xaff   :  { %v1536_v44 = vmax.f32 %v1532_v42, 0.0  ;;  %v1537_v45 = vadd.f32 %v1535_v43, %v1353_v23 }
 0xb01   :  { %v1538_v46 = vadd.f32 %v1536_v44, %v1426_v22  ;;  %1540 = vst.msk [vmem:[#allocation2] sm:$0x1] %vm1539_vm8, %v1537_v45 }
 0xb03   :  { %1541 = vst.msk [vmem:[#allocation2 + $0x1] sm:$0x1] %vm1539_vm8, %v1538_v46 }
 0xb04   :  { %1842 = shalt.err (!%p1839_p4)
}
 0xb05   :  { %s1843_s19 = scalar_lea.hbm %s2072_s2, 32 }
 0xb06   :  { %p1844_p5 = scmp.ne.s32.totalorder %s2072_s2, %s1843_s19  ;;  %p1847_p6 = scmp.lt.u32.totalorder %s1843_s19, %s2072_s2 }
 0xb08   :  { %p1849_p7 = pnand %p1847_p6, %p1844_p5 }
 0xb0a   :  { %1852 = shalt.err (!%p1849_p7)
}
 0xb0b   :  { %s1860_s23 = smov 16   ;;  %s1861_s24 = smov 1  }
 0xb0c   :  { %1553 = dma.vmem_to_hbm [thread:$0]  %s1548_s16, 32, %s2072_s2, [#allocation3], %s1860_s23, %s1860_s23, %s1861_s24  }
 0xb0d   :  { %1853 = dma.done.wait [#allocation3], 32  }
 0xb0e   :  { %1854 = vsyncadd [#allocation3], 4294967264 }
 0xb0f   :  { %1557 = vsyncpa [#allocation3], 1 }

</bundles_post_ra>
